<compile_context>
chip_gen: v6e
topology: v6e:2x2x1
jax: 0.10.0
libtpu: 0.0.40
codegen_flags: <defaults>
</compile_context>

<pallas_src>
import functools

import numpy as np
import jax
import jax.numpy as jnp
from jax import lax
from jax.experimental import pallas as pl
from jax.experimental.pallas import tpu as pltpu

_VMEM_BUDGET = 4 * 1024 * 1024     # per-step working-set target (bytes)


# ----------------------------------------------------------------------------------
# helpers
# ----------------------------------------------------------------------------------
def _largest_divisor_at_most(n, cap):
    cap = max(1, min(n, int(cap)))
    for t in range(cap, 0, -1):
        if n % t == 0:
            return t
    return 1


def _interp_matrix_T(n, mode):
    """(n, 2n) matrix M so that  y = x @ M  is the 2x upsample of the last axis.

    'nearest': out[q] = x[q // 2].
    'linear'/'bilinear' (align_corners=False, the PyTorch default):
        src = (q + 0.5)/2 - 0.5, linear blend of the two clamped neighbours.
    """
    m = np.zeros((n, 2 * n), dtype=np.float32)
    for q in range(2 * n):
        if mode == "nearest":
            m[q // 2, q] = 1.0
        else:
            src = (q + 0.5) / 2.0 - 0.5
            i0 = int(np.floor(src))
            t = src - i0
            m[min(max(i0, 0), n - 1), q] += 1.0 - t
            m[min(max(i0 + 1, 0), n - 1), q] += t
    return jnp.asarray(m)


# ----------------------------------------------------------------------------------
# Pallas kernels
# ----------------------------------------------------------------------------------
def _interp2d_kernel(x_ref, awt_ref, o_ref, *, w_even, w_odd):
    """2x nearest / bilinear upsample of a tile of images.

    x_ref  : (TN, H, W)    TN images (flattened batch*channel)
    awt_ref: (W, 2W)       1-D interpolation matrix for the width axis
    o_ref  : (TN, H, 4W)   [:, :, :2W] = even output rows, [:, :, 2W:] = odd output rows
    """
    tn, hh, ww = x_ref.shape
    w2 = awt_ref.shape[1]
    # Width upsample: one big lane-dense MXU matmul over all rows of all images in the tile.
    xw = jnp.dot(x_ref[...].reshape(tn * hh, ww), awt_ref[...],
                 preferred_element_type=jnp.float32).reshape(tn, hh, w2)
    if w_even == (0.0, 1.0) and w_odd == (1.0, 0.0):       # nearest: rows just duplicate
        even = xw
        odd = xw
    else:                                                  # bilinear row blend, edge-clamped
        prev_row = jnp.concatenate([xw[:, :1], xw[:, :-1]], axis=1)
        next_row = jnp.concatenate([xw[:, 1:], xw[:, -1:]], axis=1)
        even = w_even[0] * prev_row + w_even[1] * xw
        odd = w_odd[0] * xw + w_odd[1] * next_row
    o_ref[:, :, :w2] = even
    o_ref[:, :, w2:] = odd


def _matmul_kernel(x_ref, w_ref, o_ref):
    """y = x @ w (used for the 1-D 'linear'/'nearest' upsample of 3-D inputs)."""
    o_ref[...] = jnp.dot(x_ref[...], w_ref[...], preferred_element_type=jnp.float32)


def _conv_transpose_kernel(x_ref, xnext_ref, w_ref, b_ref, o_ref):
    """One (batch, H-tile) step of ConvTranspose2d(k=3, s=2, p=1, output_padding=1).

    x_ref    : (1, TH, W+1, C)  input rows of this tile, right-padded with one zero column
    xnext_ref: (1, 1,  W+1, C)  the row just below the tile (zero row for the last tile)
    w_ref    : (3, 3, C, Co)    PyTorch weight (Ci, Co, kh, kw) pre-transposed to (kh, kw, Ci, Co)
    b_ref    : (1, Co)
    o_ref    : (4, TH, W, Co)   the 4 output phases: plane di*2+dj holds out[2a+di, 2b+dj]
    """
    _, th, wp, c = x_ref.shape
    w = wp - 1
    co = w_ref.shape[-1]
    x_cur = x_ref[0]                                        # rows a       (TH, W+1, C)
    x_nxt = xnext_ref[0]                                    # row  a+TH    (1,  W+1, C)
    if th > 1:
        x_dn = jnp.concatenate([x_cur[1:], x_nxt], axis=0)  # rows a+1 (zero past the image end)
    else:
        x_dn = x_nxt

    def tap(v, dx):                                         # shift right by dx, flatten spatial
        return v[:, dx:dx + w, :].reshape(th * w, c)

    x00 = tap(x_cur, 0)      # x[a,   b]
    x01 = tap(x_cur, 1)      # x[a,   b+1]
    x10 = tap(x_dn, 0)       # x[a+1, b]
    x11 = tap(x_dn, 1)       # x[a+1, b+1]
    b = b_ref[...]

    def mm(xf, ky, kx):
        return jnp.dot(xf, w_ref[ky, kx], preferred_element_type=jnp.float32)

    o_ref[0] = (mm(x00, 1, 1) + b).reshape(th, w, co)                                 # (2a,   2b)
    o_ref[1] = (mm(x01, 1, 0) + mm(x00, 1, 2) + b).reshape(th, w, co)                 # (2a,   2b+1)
    o_ref[2] = (mm(x10, 0, 1) + mm(x00, 2, 1) + b).reshape(th, w, co)                 # (2a+1, 2b)
    o_ref[3] = (mm(x11, 0, 0) + mm(x10, 0, 2) + mm(x01, 2, 0) + mm(x00, 2, 2)
                + b).reshape(th, w, co)                                               # (2a+1, 2b+1)


# ----------------------------------------------------------------------------------
# Wrappers
# ----------------------------------------------------------------------------------
def interp_upsample2x_2d(x, mode):
    """x: (B, C, H, W) f32 -> (B, C, 2H, 2W); mode in {'nearest', 'bilinear'}."""
    B, C, H, W = x.shape
    rows = B * C
    awt = _interp_matrix_T(W, mode)                              # (W, 2W)
    xr = x.reshape(rows, H, W)
    per_img = (H * W + 4 * H * W) * 4 * 3                        # in + out blocks, pipelined
    tn = _largest_divisor_at_most(rows, _VMEM_BUDGET // max(per_img, 1))
    if mode == "nearest":
        w_even, w_odd = (0.0, 1.0), (1.0, 0.0)
    else:
        w_even, w_odd = (0.25, 0.75), (0.75, 0.25)
    kernel = functools.partial(_interp2d_kernel, w_even=w_even, w_odd=w_odd)
    out = pl.pallas_call(
        kernel,
        out_shape=jax.ShapeDtypeStruct((rows, H, 4 * W), jnp.float32),
        grid_spec=pltpu.PrefetchScalarGridSpec(
            num_scalar_prefetch=0,
            grid=(rows // tn,),
            in_specs=[pl.BlockSpec((tn, H, W), lambda i: (i, 0, 0)),
                      pl.BlockSpec((W, 2 * W), lambda i: (0, 0))],
            out_specs=pl.BlockSpec((tn, H, 4 * W), lambda i: (i, 0, 0)),
        ),
        compiler_params=pltpu.CompilerParams(dimension_semantics=("parallel",)),
    )(xr, awt)
    # (rows, H, [even|odd]*2W) row-major-reshapes straight to (rows, 2H, 2W): free, no transpose.
    return out.reshape(B, C, 2 * H, 2 * W)


def interp_upsample2x_1d(x, mode):
    """x: (B, C, L) f32 -> (B, C, 2L); mode in {'nearest', 'linear'}."""
    B, C, L = x.shape
    rows = B * C
    awt = _interp_matrix_T(L, mode)                              # (L, 2L)
    xr = x.reshape(rows, L)
    per_row = 3 * L * 4 * 3
    tr = _largest_divisor_at_most(rows, _VMEM_BUDGET // max(per_row, 1))
    out = pl.pallas_call(
        _matmul_kernel,
        out_shape=jax.ShapeDtypeStruct((rows, 2 * L), jnp.float32),
        grid_spec=pltpu.PrefetchScalarGridSpec(
            num_scalar_prefetch=0,
            grid=(rows // tr,),
            in_specs=[pl.BlockSpec((tr, L), lambda i: (i, 0)),
                      pl.BlockSpec((L, 2 * L), lambda i: (0, 0))],
            out_specs=pl.BlockSpec((tr, 2 * L), lambda i: (i, 0)),
        ),
        compiler_params=pltpu.CompilerParams(dimension_semantics=("parallel",)),
    )(xr, awt)
    return out.reshape(B, C, 2 * L)


def conv_transpose_upsample2x(x, w_t, bias):
    """PyTorch ConvTranspose2d(Ci, Co, 3, stride=2, padding=1, output_padding=1).

    x: (B, Ci, H, W), w_t: (Ci, Co, 3, 3), bias: (Co,)  ->  (B, Co, 2H, 2W)
    """
    B, C, H, W = x.shape
    Co = w_t.shape[1]
    xh = jnp.transpose(x, (0, 2, 3, 1))                          # NHWC
    xp = jnp.pad(xh, ((0, 0), (0, 1), (0, 1), (0, 0)))           # +1 zero row/col (bottom/right)
    per_row = ((W + 1) * C + 4 * W * Co) * 4 * 3
    th = _largest_divisor_at_most(H, _VMEM_BUDGET // max(per_row, 1))
    nh = H // th
    x_main = xp[:, :H]                                           # (B, H,  W+1, C)
    x_next = xp[:, th::th]                                       # (B, nh, W+1, C) row below each tile
    wk = jnp.transpose(w_t, (2, 3, 0, 1))                        # (3, 3, Ci, Co)
    b2 = bias.reshape(1, Co)

    out = pl.pallas_call(
        _conv_transpose_kernel,
        out_shape=jax.ShapeDtypeStruct((B * 4, H, W, Co), jnp.float32),
        grid_spec=pltpu.PrefetchScalarGridSpec(
            num_scalar_prefetch=0,
            grid=(B, nh),
            in_specs=[pl.BlockSpec((1, th, W + 1, C), lambda b, h: (b, h, 0, 0)),
                      pl.BlockSpec((1, 1, W + 1, C), lambda b, h: (b, h, 0, 0)),
                      pl.BlockSpec((3, 3, C, Co), lambda b, h: (0, 0, 0, 0)),
                      pl.BlockSpec((1, Co), lambda b, h: (0, 0))],
            out_specs=pl.BlockSpec((4, th, W, Co), lambda b, h: (b, h, 0, 0)),
        ),
        compiler_params=pltpu.CompilerParams(dimension_semantics=("parallel", "parallel")),
    )(x_main, x_next, wk, b2)

    # Interleave the 4 phase planes AND convert to NCHW with one fused XLA transpose.
    out = out.reshape(B, 2, 2, H, W, Co)
    return jnp.transpose(out, (0, 5, 3, 1, 4, 2)).reshape(B, Co, 2 * H, 2 * W)


class UpSample:
    """Pallas-TPU forward of the PyTorch UpSample module (scale factor 2)."""

    def __init__(self, type, in_channels, key=None):
        assert type in ["nearest", "bilinear", "linear", "conv"]
        self.type = type
        self.in_channels = in_channels
        if type == "conv":
            key = jax.random.PRNGKey(0) if key is None else key
            kw, kb = jax.random.split(key)
            # PyTorch ConvTranspose2d weight layout: (in_channels, out_channels, kH, kW)
            self.weight = jax.random.normal(
                kw, (in_channels, in_channels, 3, 3), jnp.float32) * 0.1
            self.bias = jax.random.normal(kb, (in_channels,), jnp.float32) * 0.1

    def __call__(self, x):
        if self.type == "conv":
            assert x.ndim == 4
            return conv_transpose_upsample2x(x, self.weight, self.bias)
        if self.type in ("nearest", "bilinear") and x.ndim == 4:
            return interp_upsample2x_2d(x, self.type)
        if self.type in ("nearest", "linear") and x.ndim == 3:
            return interp_upsample2x_1d(x, self.type)
        raise ValueError(f"mode {self.type!r} does not support input rank {x.ndim}")


# ----------------------------------------------------------------------------------
# Pure-JAX references (for validation)
# ----------------------------------------------------------------------------------
def _interp_1d_ref(x, axis):
    n = x.shape[axis]
    src = (jnp.arange(2 * n) + 0.5) / 2.0 - 0.5
    i0 = jnp.floor(src)
    t = (src - i0).astype(x.dtype)
    lo = jnp.clip(i0.astype(jnp.int32), 0, n - 1)
    hi = jnp.clip(i0.astype(jnp.int32) + 1, 0, n - 1)
    shape = [1] * x.ndim
    shape[axis] = 2 * n
    t = t.reshape(shape)
    return jnp.take(x, lo, axis=axis) * (1.0 - t) + jnp.take(x, hi, axis=axis) * t


def upsample_ref(x, mode, weight=None, bias=None):
    if mode == "nearest":
        out = x
        for ax in range(2, x.ndim):
            out = jnp.repeat(out, 2, axis=ax)
        return out
    if mode == "bilinear":
        return _interp_1d_ref(_interp_1d_ref(x, 2), 3)
    if mode == "linear":
        return _interp_1d_ref(x, 2)
    # conv: ConvTranspose2d(k=3, s=2, p=1, output_padding=1) as a dilated correlation
    w_flip = jnp.transpose(weight, (1, 0, 2, 3))[:, :, ::-1, ::-1]   # (Co, Ci, 3, 3), flipped
    y = lax.conv_general_dilated(
        x, w_flip, window_strides=(1, 1), padding=((1, 2), (1, 2)),
        lhs_dilation=(2, 2), dimension_numbers=("NCHW", "OIHW", "NCHW"))
    return y + bias.reshape(1, -1, 1, 1)


# ----------------------------------------------------------------------------------
if __name__ == "__main__":
    key = jax.random.PRNGKey(0)
    kx, kw, kx1 = jax.random.split(key, 3)

    B, C, H, W = 2, 4, 16, 16
    x = jax.random.normal(kx, (B, C, H, W), jnp.float32)       # NCHW, like PyTorch

    # --- 2-D interpolation modes ---------------------------------------------------
    for mode in ("nearest", "bilinear"):
        up = UpSample(mode, C)
        y = jax.block_until_ready(jax.jit(up)(x))
        assert y.shape == (B, C, 2 * H, 2 * W), y.shape
        y_ref = upsample_ref(x, mode)
        assert jnp.allclose(y, y_ref, rtol=1e-5, atol=1e-5), (
            mode, float(jnp.max(jnp.abs(y - y_ref))))

    # --- learned transposed-conv upsample -------------------------------------------
    up = UpSample("conv", C, key=kw)
    y = jax.block_until_ready(jax.jit(up)(x))
    assert y.shape == (B, C, 2 * H, 2 * W), y.shape
    y_ref = upsample_ref(x, "conv", up.weight, up.bias)
    assert jnp.allclose(y, y_ref, rtol=1e-4, atol=1e-4), (
        "conv", float(jnp.max(jnp.abs(y - y_ref))))

    # --- 1-D 'linear' mode (PyTorch mode='linear' requires a 3-D input) --------------
    L = 16
    x1 = jax.random.normal(kx1, (B, C, L), jnp.float32)
    up = UpSample("linear", C)
    y1 = jax.block_until_ready(jax.jit(up)(x1))
    assert y1.shape == (B, C, 2 * L), y1.shape
    y1_ref = upsample_ref(x1, "linear")
    assert jnp.allclose(y1, y1_ref, rtol=1e-5, atol=1e-5), (
        "linear", float(jnp.max(jnp.abs(y1 - y1_ref))))

    print("KERNEL_OK")
</pallas_src>

<mosaic_0001>
module attributes {stable_mosaic.version = 11 : i64} {
  func.func @_interp2d_kernel(%arg0: i32, %arg1: memref<8x16x16xf32, #tpu.memory_space<vmem>>, %arg2: memref<16x32xf32, #tpu.memory_space<vmem>>, %arg3: memref<8x16x64xf32, #tpu.memory_space<vmem>>) attributes {dimension_semantics = [#tpu.dimension_semantics<parallel>], iteration_bounds = array<i64: 1>, scalar_prefetch = 0 : i64, scratch_operands = 0 : i64, tpu.core_type = #tpu.core_type<tc>, window_params = [{transform_indices = @transform_0, window_bounds = array<i64: 8, 16, 16>}, {pipeline_mode = #tpu.pipeline_mode<synchronous>, transform_indices = @transform_1, window_bounds = array<i64: 16, 32>}, {transform_indices = @transform_2, window_bounds = array<i64: 8, 16, 64>}]} {
    %c0 = arith.constant 0 : index
    %c0_0 = arith.constant 0 : index
    %c0_1 = arith.constant 0 : index
    %0 = vector.load %arg1[%c0, %c0_0, %c0_1] : memref<8x16x16xf32, #tpu.memory_space<vmem>>, vector<8x16x16xf32>
    %1 = vector.shape_cast %0 : vector<8x16x16xf32> to vector<128x16xf32>
    %c0_2 = arith.constant 0 : index
    %c0_3 = arith.constant 0 : index
    %2 = vector.load %arg2[%c0_2, %c0_3] : memref<16x32xf32, #tpu.memory_space<vmem>>, vector<16x32xf32>
    %cst = arith.constant dense<0.000000e+00> : vector<128x32xf32>
    %3 = tpu.matmul %1, %2, %cst {dimension_numbers = #tpu.dot_dimension_numbers<[1], [0], [0], [1], [0, 0, 1, 1], [], []>} : vector<128x16xf32>, vector<16x32xf32>, vector<128x32xf32> -> vector<128x32xf32>
    %4 = vector.shape_cast %3 : vector<128x32xf32> to vector<8x16x32xf32>
    %c0_4 = arith.constant 0 : index
    %c0_5 = arith.constant 0 : index
    %c0_6 = arith.constant 0 : index
    %5 = vector.load %arg3[%c0_4, %c0_5, %c0_6] : memref<8x16x64xf32, #tpu.memory_space<vmem>>, vector<8x16x32xf32>
    tpu.vector_store %arg3[%c0_4, %c0_5, %c0_6], %4 {strides = array<i32>} : memref<8x16x64xf32, #tpu.memory_space<vmem>>, vector<8x16x32xf32>,
    %c0_7 = arith.constant 0 : index
    %c0_8 = arith.constant 0 : index
    %c32 = arith.constant 32 : index
    %6 = vector.load %arg3[%c0_7, %c0_8, %c32] : memref<8x16x64xf32, #tpu.memory_space<vmem>>, vector<8x16x32xf32>
    tpu.vector_store %arg3[%c0_7, %c0_8, %c32], %4 {strides = array<i32>} : memref<8x16x64xf32, #tpu.memory_space<vmem>>, vector<8x16x32xf32>,
    return
  }
  func.func @transform_0(%arg0: i32) -> (i32, i32, i32) {
    %c0_i32 = arith.constant 0 : i32
    %c0_i32_0 = arith.constant 0 : i32
    %c0_i32_1 = arith.constant 0 : i32
    return %arg0, %c0_i32, %c0_i32_0 : i32, i32, i32
  }
  func.func @transform_1(%arg0: i32) -> (i32, i32) {
    %c0_i32 = arith.constant 0 : i32
    %c0_i32_0 = arith.constant 0 : i32
    %c0_i32_1 = arith.constant 0 : i32
    return %c0_i32, %c0_i32_0 : i32, i32
  }
  func.func @transform_2(%arg0: i32) -> (i32, i32, i32) {
    %c0_i32 = arith.constant 0 : i32
    %c0_i32_0 = arith.constant 0 : i32
    %c0_i32_1 = arith.constant 0 : i32
    return %arg0, %c0_i32, %c0_i32_0 : i32, i32, i32
  }
}

</mosaic_0001>

<bundles_post_ra>
// kernel: _unnamed_function_.1
= control target key start
LH: loop header
LB: loop body
LE: loop exit
PB: predicated region body
PF: predicated region fallthrough
CT: control target
= control target key end

     0   :  { %7 = vsyncpa [#allocation3], 0  ;;  %s656_s0 = inlined_call_operand.hbm [shape: f32[8,16,16], index: 0, kind: input, shape index: {}]   ;;  %s657_s1 = inlined_call_operand.hbm [shape: f32[16,32], index: 1, kind: input, shape index: {}]   ;;  %s658_s2 = inlined_call_operand.vmem [shape: f32[8,16,64], index: 2, kind: output, shape index: {}]  }
   0x1   :  { %8 = vsyncpa [#allocation5], 0  ;;  %s470_s9 = smov [#allocation2]  }
   0x2   :  { %s14_s10 = sshll.u32 %s470_s9, 4  ;;  %s15_s10 = int_to_ptr.vmem [resolvable:$true] %s14_s10 }
   0x3   :  { %s434_s11 = scalar_lea.vmem %s15_s10, 2048  ;;  %p439_p1 = scmp.lt.s32.totalorder %s15_s10, %s15_s10 }
   0x4   :  { %p435_p0 = scmp.ne.s32.totalorder %s15_s10, %s434_s11  ;;  %p440_p2 = scmp.lt.s32.totalorder %s434_s11, %s434_s11 }
   0x6   :  { %p441_p3 = por %p440_p2, %p439_p1 }
   0x8   :  { %p442_p4 = pnand %p441_p3, %p435_p0 }
   0xa   :  { %445 = shalt.err (!%p442_p4)
}
   0xb   :  { %s471_s12 = smov 128   ;;  %s472_s13 = smov 8  }
   0xc   :  { %20 = dma.hbm_to_vmem [thread:$0]  %s656_s0, 2048, %s15_s10, [#allocation3], %s471_s12, %s471_s12, %s472_s13  }
   0xd   :  { %s473_s16 = smov [#allocation4]  }
   0xe   :  { %s26_s17 = sshll.u32 %s473_s16, 4  ;;  %s27_s17 = int_to_ptr.vmem [resolvable:$true] %s26_s17 }
   0xf   :  { %s454_s18 = scalar_lea.vmem %s27_s17, 256  ;;  %p459_p6 = scmp.lt.s32.totalorder %s27_s17, %s27_s17 }
  0x10   :  { %p455_p5 = scmp.ne.s32.totalorder %s27_s17, %s454_s18  ;;  %p460_p7 = scmp.lt.s32.totalorder %s454_s18, %s454_s18 }
  0x12   :  { %p461_p8 = por %p460_p7, %p459_p6 }
  0x14   :  { %p462_p9 = pnand %p461_p8, %p455_p5 }
  0x16   :  { %465 = shalt.err (!%p462_p9)
}
  0x17   :  { %32 = dma.hbm_to_vmem [thread:$0]  %s657_s1, 256, %s27_s17, [#allocation5], %s471_s12, %s471_s12, %s472_s13  }
  0x18   :  { %466 = dma.done.wait [#allocation3], 2048  }
  0x19   :  { %467 = vsyncadd [#allocation3], 4294965248 }
  0x1a   :  { %468 = dma.done.wait [#allocation5], 256  }
  0x1b   :  { %469 = vsyncadd [#allocation5], 4294967040  ;;  %v56_v0 = vld [vmem:[#allocation4 + $0x8] sm:$0xff]  ;;  %v55_v1 = vld [vmem:[#allocation4] sm:$0xff]  ;;  %vm57_vm0 = vcmask 130048   ;;  %vm251_vm1 = vcmask 261120  }
  0x1c   :  { %389 = vmatprep.subr.mxu0 %v56_v0  ;;  %417 = vmatprep.subr.mxu1 %v56_v0  ;;  %v39_v2 = vld [vmem:[#allocation2] sm:$0xff]  ;;  %v40_v4 = vld [vmem:[#allocation2 + $0x8] sm:$0xff]  ;;  %v41_v6 = vld [vmem:[#allocation2 + $0x10] sm:$0xff]  ;;  %s474_s23 = smov 32   ;;  %vm332_vm2 = vcmask 523520  }
  0x1d   :  { %390 = vmatpush3.msra.mxu0 %v56_v0  ;;  %419 = vmatpush3.msra.mxu1 %v56_v0  ;;  %v47_v3 = vld [vmem:[#allocation2 + $0x40] sm:$0xff]  ;;  %v48_v5 = vld [vmem:[#allocation2 + $0x48] sm:$0xff]  ;;  %v49_v7 = vld [vmem:[#allocation2 + $0x50] sm:$0xff] }
  0x1e   :  { %391 = vmatprep.subr.mxu0 %v55_v1  ;;  %418 = vmatprep.subr.mxu1 %v55_v1  ;;  %v42_v8 = vld [vmem:[#allocation2 + $0x18] sm:$0xff]  ;;  %v43_v10 = vld [vmem:[#allocation2 + $0x20] sm:$0xff]  ;;  %v44_v12 = vld [vmem:[#allocation2 + $0x28] sm:$0xff] }
  0x1f   :  { %392 = vmatpush3.msra.mxu0 %v55_v1  ;;  %420 = vmatpush3.msra.mxu1 %v55_v1  ;;  %v50_v9 = vld [vmem:[#allocation2 + $0x58] sm:$0xff]  ;;  %v51_v11 = vld [vmem:[#allocation2 + $0x60] sm:$0xff]  ;;  %v52_v13 = vld [vmem:[#allocation2 + $0x68] sm:$0xff] }
  0x20   :  { %393 = vmatprep.mubr.msk.f32.mxu0 %vm57_vm0, %v39_v2  ;;  %405 = vmatprep.mubr.msk.f32.mxu1 %vm57_vm0, %v47_v3  ;;  %v45_v14 = vld [vmem:[#allocation2 + $0x30] sm:$0xff]  ;;  %v46_v16 = vld [vmem:[#allocation2 + $0x38] sm:$0xff] }
  0x21   :  { %394 = vmatmul.mubr.msk.f32.vlgmr.msra.gmra.mxu0 %vm57_vm0, %v40_v4  ;;  %406 = vmatmul.mubr.msk.f32.vlgmr.msra.gmra.mxu1 %vm57_vm0, %v48_v5  ;;  %v53_v15 = vld [vmem:[#allocation2 + $0x70] sm:$0xff]  ;;  %v54_v17 = vld [vmem:[#allocation2 + $0x78] sm:$0xff] }
  0x22   :  { %396 = vmatprep.mubr.msk.f32.mxu0 %vm57_vm0, %v41_v6  ;;  %408 = vmatprep.mubr.msk.f32.mxu1 %vm57_vm0, %v49_v7 }
  0x25   :  { %397 = vmatmul.mubr.msk.f32.gmra.mxu0 %vm57_vm0, %v42_v8  ;;  %409 = vmatmul.mubr.msk.f32.gmra.mxu1 %vm57_vm0, %v50_v9 }
  0x26   :  { %399 = vmatprep.mubr.msk.f32.mxu0 %vm57_vm0, %v43_v10  ;;  %411 = vmatprep.mubr.msk.f32.mxu1 %vm57_vm0, %v51_v11 }
  0x29   :  { %400 = vmatmul.mubr.msk.f32.gmra.mxu0 %vm57_vm0, %v44_v12  ;;  %412 = vmatmul.mubr.msk.f32.gmra.mxu1 %vm57_vm0, %v52_v13 }
  0x2a   :  { %402 = vmatprep.mubr.msk.f32.mxu0 %vm57_vm0, %v45_v14  ;;  %414 = vmatprep.mubr.msk.f32.mxu1 %vm57_vm0, %v53_v15 }
  0x2d   :  { %403 = vmatmul.mubr.msk.f32.gmra.mxu0 %vm57_vm0, %v46_v16  ;;  %415 = vmatmul.mubr.msk.f32.gmra.mxu1 %vm57_vm0, %v54_v17 }
  0xe1   :  { %v395_v18 = vpop.f32.mrf.mxu0  ;;  %v407_v19 = vpop.f32.mrf.mxu1 }
  0xe2   :  { %253 = vst.msk [vmem:[%s658_s2 + $0x8] sm:$0xff] %vm251_vm1, %v395_v18  ;;  %261 = vst.msk [vmem:[%s658_s2 + $0x48] sm:$0xff] %vm251_vm1, %v407_v19  ;;  %302 = vrot.lane.b32.xlu1 %v407_v19, %s474_s23  ;;  %286 = vrot.lane.b32.xlu0 %v395_v18, %s474_s23 }
  0xe3   :  { %v172_v20 = vpop.f32.mrf.mxu0  ;;  %v212_v21 = vpop.f32.mrf.mxu1 }
  0xe4   :  { %252 = vst.msk [vmem:[%s658_s2] sm:$0xff] %vm251_vm1, %v172_v20  ;;  %260 = vst.msk [vmem:[%s658_s2 + $0x40] sm:$0xff] %vm251_vm1, %v212_v21 }
  0xe5   :  { %v398_v22 = vpop.f32.mrf.mxu0  ;;  %v410_v23 = vpop.f32.mrf.mxu1 }
  0xe6   :  { %255 = vst.msk [vmem:[%s658_s2 + $0x18] sm:$0xff] %vm251_vm1, %v398_v22  ;;  %284 = vrot.lane.b32.xlu0 %v172_v20, %s474_s23  ;;  %290 = vrot.lane.b32.xlu1 %v398_v22, %s474_s23  ;;  %263 = vst.msk [vmem:[%s658_s2 + $0x58] sm:$0xff] %vm251_vm1, %v410_v23 }
  0xe7   :  { %v182_v24 = vpop.f32.mrf.mxu0  ;;  %v222_v25 = vpop.f32.mrf.mxu1 }
  0xe8   :  { %254 = vst.msk [vmem:[%s658_s2 + $0x10] sm:$0xff] %vm251_vm1, %v182_v24  ;;  %262 = vst.msk [vmem:[%s658_s2 + $0x50] sm:$0xff] %vm251_vm1, %v222_v25 }
  0xe9   :  { %v401_v26 = vpop.f32.mrf.mxu0  ;;  %v413_v27 = vpop.f32.mrf.mxu1 }
  0xea   :  { %300 = vrot.lane.b32.xlu0 %v212_v21, %s474_s23  ;;  %306 = vrot.lane.b32.xlu1 %v410_v23, %s474_s23  ;;  %257 = vst.msk [vmem:[%s658_s2 + $0x28] sm:$0xff] %vm251_vm1, %v401_v26  ;;  %265 = vst.msk [vmem:[%s658_s2 + $0x68] sm:$0xff] %vm251_vm1, %v413_v27 }
  0xeb   :  { %v192_v28 = vpop.f32.mrf.mxu0  ;;  %v232_v29 = vpop.f32.mrf.mxu1 }
  0xec   :  { %256 = vst.msk [vmem:[%s658_s2 + $0x20] sm:$0xff] %vm251_vm1, %v192_v28  ;;  %264 = vst.msk [vmem:[%s658_s2 + $0x60] sm:$0xff] %vm251_vm1, %v232_v29 }
  0xed   :  { %v404_v30 = vpop.f32.mrf.mxu0  ;;  %v416_v31 = vpop.f32.mrf.mxu1 }
  0xee   :  { %304 = vrot.lane.b32.xlu0 %v222_v25, %s474_s23  ;;  %288 = vrot.lane.b32.xlu1 %v182_v24, %s474_s23  ;;  %259 = vst.msk [vmem:[%s658_s2 + $0x38] sm:$0xff] %vm251_vm1, %v404_v30  ;;  %267 = vst.msk [vmem:[%s658_s2 + $0x78] sm:$0xff] %vm251_vm1, %v416_v31 }
  0xef   :  { %v202_v32 = vpop.f32.mrf.mxu0  ;;  %v242_v33 = vpop.f32.mrf.mxu1 }
  0xf0   :  { %258 = vst.msk [vmem:[%s658_s2 + $0x30] sm:$0xff] %vm251_vm1, %v202_v32  ;;  %266 = vst.msk [vmem:[%s658_s2 + $0x70] sm:$0xff] %vm251_vm1, %v242_v33 }
  0xf2   :  { %294 = vrot.lane.b32.xlu1 %v401_v26, %s474_s23  ;;  %292 = vrot.lane.b32.xlu0 %v192_v28, %s474_s23 }
  0xf6   :  { %310 = vrot.lane.b32.xlu1 %v413_v27, %s474_s23  ;;  %308 = vrot.lane.b32.xlu0 %v232_v29, %s474_s23 }
  0xfa   :  { %298 = vrot.lane.b32.xlu1 %v404_v30, %s474_s23  ;;  %296 = vrot.lane.b32.xlu0 %v202_v32, %s474_s23 }
  0xfe   :  { %314 = vrot.lane.b32.xlu1 %v416_v31, %s474_s23  ;;  %312 = vrot.lane.b32.xlu0 %v242_v33, %s474_s23 }
 0x154   :  { %v303_v34 = vpop.permute.xlu1 %302  ;;  %v287_v35 = vpop.permute.xlu0 %286 }
 0x155   :  { %342 = vst.msk [vmem:[%s658_s2 + $0x48] sm:$0xff] %vm332_vm2, %v303_v34  ;;  %334 = vst.msk [vmem:[%s658_s2 + $0x8] sm:$0xff] %vm332_vm2, %v287_v35 }
 0x158   :  { %v285_v36 = vpop.permute.xlu0 %284  ;;  %v291_v37 = vpop.permute.xlu1 %290 }
 0x159   :  { %333 = vst.msk [vmem:[%s658_s2] sm:$0xff] %vm332_vm2, %v285_v36  ;;  %336 = vst.msk [vmem:[%s658_s2 + $0x18] sm:$0xff] %vm332_vm2, %v291_v37 }
 0x15c   :  { %v301_v38 = vpop.permute.xlu0 %300  ;;  %v307_v39 = vpop.permute.xlu1 %306 }
 0x15d   :  { %341 = vst.msk [vmem:[%s658_s2 + $0x40] sm:$0xff] %vm332_vm2, %v301_v38  ;;  %344 = vst.msk [vmem:[%s658_s2 + $0x58] sm:$0xff] %vm332_vm2, %v307_v39 }
 0x160   :  { %v305_v40 = vpop.permute.xlu0 %304  ;;  %v289_v41 = vpop.permute.xlu1 %288 }
 0x161   :  { %343 = vst.msk [vmem:[%s658_s2 + $0x50] sm:$0xff] %vm332_vm2, %v305_v40  ;;  %335 = vst.msk [vmem:[%s658_s2 + $0x10] sm:$0xff] %vm332_vm2, %v289_v41 }
 0x164   :  { %v295_v42 = vpop.permute.xlu1 %294  ;;  %v293_v43 = vpop.permute.xlu0 %292 }
 0x165   :  { %338 = vst.msk [vmem:[%s658_s2 + $0x28] sm:$0xff] %vm332_vm2, %v295_v42  ;;  %337 = vst.msk [vmem:[%s658_s2 + $0x20] sm:$0xff] %vm332_vm2, %v293_v43 }
 0x168   :  { %v311_v44 = vpop.permute.xlu1 %310  ;;  %v309_v45 = vpop.permute.xlu0 %308 }
 0x169   :  { %346 = vst.msk [vmem:[%s658_s2 + $0x68] sm:$0xff] %vm332_vm2, %v311_v44  ;;  %345 = vst.msk [vmem:[%s658_s2 + $0x60] sm:$0xff] %vm332_vm2, %v309_v45 }
 0x16c   :  { %v299_v46 = vpop.permute.xlu1 %298  ;;  %v297_v47 = vpop.permute.xlu0 %296 }
 0x16d   :  { %340 = vst.msk [vmem:[%s658_s2 + $0x38] sm:$0xff] %vm332_vm2, %v299_v46  ;;  %339 = vst.msk [vmem:[%s658_s2 + $0x30] sm:$0xff] %vm332_vm2, %v297_v47 }
 0x170   :  { %v315_v48 = vpop.permute.xlu1 %314  ;;  %v313_v49 = vpop.permute.xlu0 %312 }
 0x171   :  { %348 = vst.msk [vmem:[%s658_s2 + $0x78] sm:$0xff] %vm332_vm2, %v315_v48  ;;  %347 = vst.msk [vmem:[%s658_s2 + $0x70] sm:$0xff] %vm332_vm2, %v313_v49 }
 0x172   :  { %353 = vsyncpa [#allocation3], 1 }
 0x173   :  { %354 = vsyncpa [#allocation5], 1 }

</bundles_post_ra>
